<compile_context>
chip_gen: v6e
topology: v6e:2x2x1
jax: 0.10.0
libtpu: 0.0.40
codegen_flags: <defaults>
</compile_context>

<pallas_src>
import jax
import jax.numpy as jnp
from jax.experimental import pallas as pl
from jax.experimental.pallas import tpu as pltpu

BATCH = 2   # x rows
IN_F = 3    # in_features
OUT_F = 2   # out_features
STACK = 2   # torch.stack((y, y), dim=1) duplicates the output twice


def linear_stack_sum_kernel(x_ref, w_ref, b_ref, o_ref):
    # x_ref: (BATCH, IN_F) f32 VMEM
    # w_ref: (OUT_F, IN_F) f32 VMEM
    # b_ref: (1, OUT_F)    f32 VMEM
    # o_ref: (1,)          f32 SMEM
    #
    # sum_{b,o,k} x[b,k] * w[o,k] = dot(colsum(x), colsum(w))
    colsum_x = jnp.sum(x_ref[...], axis=0, keepdims=True)   # (1, IN_F) sublane reduce
    colsum_w = jnp.sum(w_ref[...], axis=0, keepdims=True)   # (1, IN_F)
    dot_term = jnp.sum(colsum_x * colsum_w)                  # scalar (lane reduce)

    # bias is broadcast over BATCH rows before the global sum.
    bias_term = jnp.float32(BATCH) * jnp.sum(b_ref[...])     # scalar

    # stack((y, y), dim=1).sum() == STACK * y.sum()
    o_ref[0] = jnp.float32(STACK) * (dot_term + bias_term)


def model_forward(x, w, b):
    # Only wrapper-side op: a metadata-only reshape of the bias to 2-D so the
    # kernel sees a plain (1, OUT_F) VMEM tile.  No slab packing, no extra
    # HBM writes before the kernel.
    b2 = b.reshape(1, OUT_F).astype(jnp.float32)
    x = x.astype(jnp.float32)
    w = w.astype(jnp.float32)

    out = pl.pallas_call(
        linear_stack_sum_kernel,
        out_shape=jax.ShapeDtypeStruct((1,), jnp.float32),
        in_specs=[
            pl.BlockSpec(memory_space=pltpu.VMEM),   # x  (2, 3)
            pl.BlockSpec(memory_space=pltpu.VMEM),   # w  (2, 3)
            pl.BlockSpec(memory_space=pltpu.VMEM),   # b  (1, 2)
        ],
        out_specs=pl.BlockSpec(memory_space=pltpu.SMEM),
        cost_estimate=pl.CostEstimate(
            flops=2 * BATCH * IN_F * OUT_F,          # ~24 useful flops
            transcendentals=0,
            bytes_accessed=(BATCH * IN_F + OUT_F * IN_F + OUT_F + 1) * 4,
        ),
        compiler_params=pltpu.CompilerParams(vmem_limit_bytes=1 << 20),
    )(x, w, b2)
    return out[0]  # scalar, matching torch.sum(...) -> 0-d tensor


if __name__ == "__main__":
    key = jax.random.PRNGKey(0)
    kx, kw, kb = jax.random.split(key, 3)

    # Inputs / deterministic params (nn.Linear(3, 2) shapes).
    x = jax.random.normal(kx, (BATCH, IN_F), dtype=jnp.float32)
    w = jax.random.normal(kw, (OUT_F, IN_F), dtype=jnp.float32) * 0.1
    b = jax.random.normal(kb, (OUT_F,), dtype=jnp.float32) * 0.1

    out = model_forward(x, w, b)
    out = jax.block_until_ready(out)

    # Pure-JAX reference check (matches the PyTorch module exactly).
    y_ref = x @ w.T + b
    ref = jnp.sum(jnp.stack((y_ref, y_ref), axis=1))
    assert jnp.allclose(out, ref, rtol=1e-5, atol=1e-5), (out, ref)

    print("KERNEL_OK")
</pallas_src>

<mosaic_0001>
module attributes {stable_mosaic.version = 11 : i64} {
  func.func @linear_stack_sum_kernel(%arg0: memref<2x3xf32, #tpu.memory_space<vmem>>, %arg1: memref<2x3xf32, #tpu.memory_space<vmem>>, %arg2: memref<1x2xf32, #tpu.memory_space<vmem>>, %arg3: memref<1xf32, #tpu.memory_space<smem>>) attributes {dimension_semantics = [], scalar_prefetch = 0 : i64, scratch_operands = 0 : i64, tpu.core_type = #tpu.core_type<tc>} {
    %c0 = arith.constant 0 : index
    %c0_0 = arith.constant 0 : index
    %0 = vector.load %arg0[%c0, %c0_0] : memref<2x3xf32, #tpu.memory_space<vmem>>, vector<2x3xf32>
    %cst = arith.constant dense<0.000000e+00> : vector<3xf32>
    %1 = vector.multi_reduction <add>, %0, %cst [0] : vector<2x3xf32> to vector<3xf32>
    %2 = vector.shape_cast %1 : vector<3xf32> to vector<1x3xf32>
    %c0_1 = arith.constant 0 : index
    %c0_2 = arith.constant 0 : index
    %3 = vector.load %arg1[%c0_1, %c0_2] : memref<2x3xf32, #tpu.memory_space<vmem>>, vector<2x3xf32>
    %cst_3 = arith.constant dense<0.000000e+00> : vector<3xf32>
    %4 = vector.multi_reduction <add>, %3, %cst_3 [0] : vector<2x3xf32> to vector<3xf32>
    %5 = vector.shape_cast %4 : vector<3xf32> to vector<1x3xf32>
    %6 = arith.mulf %2, %5 : vector<1x3xf32>
    %7 = vector.shape_cast %6 : vector<1x3xf32> to vector<1x1x3xf32>
    %cst_4 = arith.constant dense<0.000000e+00> : vector<1xf32>
    %8 = vector.multi_reduction <add>, %7, %cst_4 [1, 2] : vector<1x1x3xf32> to vector<1xf32>
    %9 = vector.shape_cast %8 : vector<1xf32> to vector<1x1x1xf32>
    %10 = vector.extract %9[0, 0, 0] : f32 from vector<1x1x1xf32>
    %c0_5 = arith.constant 0 : index
    %c0_6 = arith.constant 0 : index
    %11 = vector.load %arg2[%c0_5, %c0_6] : memref<1x2xf32, #tpu.memory_space<vmem>>, vector<1x2xf32>
    %12 = vector.shape_cast %11 : vector<1x2xf32> to vector<1x1x2xf32>
    %cst_7 = arith.constant dense<0.000000e+00> : vector<1xf32>
    %13 = vector.multi_reduction <add>, %12, %cst_7 [1, 2] : vector<1x1x2xf32> to vector<1xf32>
    %14 = vector.shape_cast %13 : vector<1xf32> to vector<1x1x1xf32>
    %15 = vector.extract %14[0, 0, 0] : f32 from vector<1x1x1xf32>
    %cst_8 = arith.constant 2.000000e+00 : f32
    %16 = arith.mulf %cst_8, %15 : f32
    %17 = arith.addf %10, %16 : f32
    %cst_9 = arith.constant 2.000000e+00 : f32
    %18 = arith.mulf %cst_9, %17 : f32
    %c0_10 = arith.constant 0 : index
    %19 = memref.load %arg3[%c0_10] : memref<1xf32, #tpu.memory_space<smem>>
    memref.store %18, %arg3[%c0_10] : memref<1xf32, #tpu.memory_space<smem>>
    return
  }
}

</mosaic_0001>

<bundles_post_ra>
// kernel: tpu_custom_call.1
= control target key start
LH: loop header
LB: loop body
LE: loop exit
PB: predicated region body
PF: predicated region fallthrough
CT: control target
= control target key end

     0   :  { %8 = vsyncpa [#allocation3], 0  ;;  %s196_s0 = inlined_call_operand.hbm [shape: f32[2,3], index: 0, kind: input, shape index: {}]   ;;  %s197_s1 = inlined_call_operand.hbm [shape: f32[2,3], index: 1, kind: input, shape index: {}]   ;;  %s198_s2 = inlined_call_operand.vmem [shape: f32[1,2], index: 2, kind: input, shape index: {}]   ;;  %s199_s3 = inlined_call_operand.hbm [shape: f32[1], index: 3, kind: output, shape index: {}]  }
   0x1   :  { %9 = vsyncpa [#allocation6], 0 }
   0x2   :  { %10 = vsyncpa [#allocation4], 0  ;;  %s161_s12 = smov [#allocation2]   ;;  %s162_s14 = smov [#allocation5]  }
   0x3   :  { %s17_s13 = sshll.u32 %s161_s12, 4  ;;  %s27_s15 = sshll.u32 %s162_s14, 4  ;;  %s18_s13 = int_to_ptr.vmem [resolvable:$true] %s17_s13  ;;  %s28_s15 = int_to_ptr.vmem [resolvable:$true] %s27_s15 }
   0x4   :  { %s115_s16 = scalar_lea.vmem %s18_s13, 32  ;;  %p120_p1 = scmp.lt.s32.totalorder %s18_s13, %s18_s13 }
   0x5   :  { %p116_p0 = scmp.ne.s32.totalorder %s18_s13, %s115_s16  ;;  %p121_p2 = scmp.lt.s32.totalorder %s115_s16, %s115_s16 }
   0x7   :  { %p122_p3 = por %p121_p2, %p120_p1 }
   0x9   :  { %p123_p4 = pnand %p122_p3, %p116_p0 }
   0xb   :  { %126 = shalt.err (!%p123_p4)
}
   0xc   :  { %20 = dma.hbm_to_vmem [thread:$0]  %s196_s0, 32, %s18_s13, [#allocation3]  }
   0xd   :  { %s135_s19 = scalar_lea.vmem %s28_s15, 32  ;;  %p140_p6 = scmp.lt.s32.totalorder %s28_s15, %s28_s15 }
   0xe   :  { %p136_p5 = scmp.ne.s32.totalorder %s28_s15, %s135_s19  ;;  %p141_p7 = scmp.lt.s32.totalorder %s135_s19, %s135_s19 }
  0x10   :  { %p142_p8 = por %p141_p7, %p140_p6 }
  0x12   :  { %p143_p9 = pnand %p142_p8, %p136_p5 }
  0x14   :  { %146 = shalt.err (!%p143_p9)
}
  0x15   :  { %30 = dma.hbm_to_vmem [thread:$0]  %s197_s1, 32, %s28_s15, [#allocation6]  }
  0x16   :  { %155 = dma.done.wait [#allocation3], 32  }
  0x17   :  { %156 = vsyncadd [#allocation3], 4294967264 }
  0x18   :  { %157 = dma.done.wait [#allocation6], 32  }
  0x19   :  { %158 = vsyncadd [#allocation6], 4294967264  ;;  %vm40_vm0 = vcmask 17408   ;;  %v39_v0 = vld [vmem:[#allocation2] sm:$0x3]  ;;  %vm57_vm1 = vcmask 16384  }
  0x1a   :  { %v48_v1 = vld [vmem:[#allocation5] sm:$0x3]  ;;  %v41_v2 = vsel %vm40_vm0, %v39_v0, 0.0  ;;  %v68_v17 = vld [vmem:[%s198_s2] sm:$0x1]  ;;  %vm69_vm2 = vcmask 8192  }
  0x1b   :  { %v49_v3 = vsel %vm40_vm0, %v48_v1, 0.0  ;;  %v42_v4 = vrot.slane %v41_v2, 4  ;;  %v70_v19 = vsel %vm69_vm2, %v68_v17, 0.0  ;;  %s163_s26 = smov [#allocation7]  }
  0x1c   :  { %v50_v5 = vrot.slane %v49_v3, 4 }
  0x1d   :  { %v43_v6 = vadd.f32 %v42_v4, %v41_v2 }
  0x1e   :  { %v51_v7 = vadd.f32 %v50_v5, %v49_v3 }
  0x1f   :  { %v44_v8 = vrot.slane %v43_v6, 2 }
  0x20   :  { %v52_v9 = vrot.slane %v51_v7, 2 }
  0x21   :  { %v45_v10 = vadd.f32 %v44_v8, %v43_v6 }
  0x22   :  { %v53_v11 = vadd.f32 %v52_v9, %v51_v7 }
  0x23   :  { %v46_v12 = vrot.slane %v45_v10, 1 }
  0x24   :  { %v54_v13 = vrot.slane %v53_v11, 1 }
  0x25   :  { %v47_v14 = vadd.f32 %v46_v12, %v45_v10 }
  0x26   :  { %v55_v15 = vadd.f32 %v54_v13, %v53_v11 }
  0x28   :  { %v56_v16 = vmul.f32 %v55_v15, %v47_v14 }
  0x2a   :  { %v58_v18 = vsel %vm57_vm1, %v56_v16, 0.0 }
  0x2b   :  { %59 = vadd.xlane.f32.xlu0 %v58_v18 }
  0x2f   :  { %71 = vadd.xlane.f32.xlu0 %v70_v19 }
  0xb4   :  { %v60_v20 = vpop.xlane.xlu0 %59 }
  0xb5   :  { %v61_v21 = vrot.slane %v60_v20, 4 }
  0xb7   :  { %v62_v22 = vadd.f32 %v61_v21, %v60_v20 }
  0xb8   :  { %v72_v23 = vpop.xlane.xlu0 %71 }
  0xb9   :  { %v63_v24 = vrot.slane %v62_v22, 2  ;;  %v73_v25 = vrot.slane %v72_v23, 4 }
  0xbb   :  { %v74_v26 = vadd.f32 %v73_v25, %v72_v23  ;;  %v64_v27 = vadd.f32 %v63_v24, %v62_v22 }
  0xbd   :  { %v75_v28 = vrot.slane %v74_v26, 2  ;;  %v65_v29 = vrot.slane %v64_v27, 1 }
  0xbf   :  { %v76_v30 = vadd.f32 %v75_v28, %v74_v26  ;;  %v66_v31 = vadd.f32 %v65_v29, %v64_v27 }
  0xc1   :  { %100 = vpush %v66_v31  ;;  %v77_v32 = vrot.slane %v76_v30, 1 }
  0xc3   :  { %v78_v33 = vadd.f32 %v77_v32, %v76_v30 }
  0xc5   :  { %102 = vpush %v78_v33 }
  0xf2   :  { %s101_s2 = spop %100 }
  0xf6   :  { %s103_s22 = spop %102 }
  0xf7   :  { %s80_s23 = smul.f32 2.0, %s103_s22 }
  0xf9   :  { %s81_s24 = sadd.f32 %s101_s2, %s80_s23 }
  0xfb   :  { %s82_s25 = smul.f32 2.0, %s81_s24 }
  0xfd   :  { %84 = sst [smem:[#allocation7]] %s82_s25 }
  0xfe   :  { %92 = dma.smem_to_hbm %s163_s26, 16, %s199_s3, [#allocation4]  }
  0xff   :  { %159 = dma.done.wait [#allocation4], 16  }
 0x100   :  { %160 = vsyncadd [#allocation4], 4294967280 }
 0x101   :  { %96 = sfence }
 0x102   :  { %97 = vsyncpa [#allocation3], 1 }
 0x103   :  { %98 = vsyncpa [#allocation6], 1 }
 0x104   :  { %99 = vsyncpa [#allocation4], 1 }

</bundles_post_ra>
